<compile_context>
chip_gen: v5e
topology: v5e:2x2
jax: 0.10.0
libtpu: 0.0.40
codegen_flags: <defaults>
</compile_context>

<pallas_src>
import jax
import jax.numpy as jnp
from jax.experimental import pallas as pl
from jax.experimental.pallas import tpu as pltpu


W_PAD = 128   # lane-padded width used for the logits weight / bias slab
OUT_W = 2     # true number of logits (CartPole actions)


def _round_up(x, m):
    return ((x + m - 1) // m) * m


def mlp_kernel(x_ref, w_in_ref, w_blk_ref, bias_ref, w_out_ref, o_ref):
    """One batch tile: x:[TB,4] -> o:[TB,OUT_W] logits."""
    H = w_in_ref.shape[1]
    L = w_blk_ref.shape[0]
    out_w = o_ref.shape[1]

    x = x_ref[...]                                    # [TB, 4] f32
    w_in = w_in_ref[...]                              # [4, H]  f32

    # K=4 input projection on the VPU (4 broadcast FMAs) -> avoids an MXU
    # push/pop latency before the first block matmul.
    h = x[:, 0:1] * w_in[0:1, :]
    for k in range(1, x.shape[1]):
        h = h + x[:, k:k + 1] * w_in[k:k + 1, :]
    h = h + bias_ref[0:1, :H]                         # [TB, H] f32

    # L is tiny (2) -> static unroll; switch to lax.fori_loop(unroll=True) if L grows.
    for l in range(L):
        y = jnp.dot(h.astype(jnp.bfloat16), w_blk_ref[l],
                    preferred_element_type=jnp.float32)      # bf16 MXU, f32 acc
        y = y + bias_ref[l + 1:l + 2, :H]             # Linear bias with BN pre-folded in
        y = y * jax.nn.sigmoid(y)                     # SiLU (f32 elementwise, v5e-safe)
        # Dropout (eval mode) == identity
        h = h + y                                     # residual add

    o = jnp.dot(h.astype(jnp.bfloat16), w_out_ref[...],
                preferred_element_type=jnp.float32)   # [TB, W_PAD] f32
    # Narrow store: only the real logits go back to HBM (8 B/row instead of 512 B/row).
    o_ref[...] = o[:, :out_w] + bias_ref[L + 1:L + 2, :out_w]


def prepare_params(p, eps=1e-5):
    """Fold eval-mode BN into the block Linears, pack biases, cast MXU weights to bf16."""
    H = p["w_in"].shape[1]
    L = p["w_blk"].shape[0]
    n_out = p["w_out"].shape[1]

    scale = p["gamma"] * jax.lax.rsqrt(p["var"] + eps)                 # (L, 1, H)
    w_blk = p["w_blk"] * scale                                         # scale each output column
    b_blk = (p["b_blk"] - p["mean"]) * scale + p["beta"]               # (L, 1, H)

    bias = jnp.zeros((L + 2, W_PAD), jnp.float32)
    bias = bias.at[0, :H].set(p["b_in"].reshape(H))
    bias = bias.at[1:L + 1, :H].set(b_blk.reshape(L, H))
    bias = bias.at[L + 1, :n_out].set(p["b_out"].reshape(n_out))

    w_out = jnp.zeros((H, W_PAD), jnp.float32)
    w_out = w_out.at[:, :n_out].set(p["w_out"])

    return dict(
        w_in=p["w_in"].astype(jnp.float32),        # stays f32 (VPU path)
        w_blk=w_blk.astype(jnp.bfloat16),          # MXU operands in bf16
        bias=bias,                                 # f32 bias slab
        w_out=w_out.astype(jnp.bfloat16),
    )


def model_forward(x, prep, *, tile_b=1024):
    B = x.shape[0]
    H = prep["w_in"].shape[1]
    L = prep["w_blk"].shape[0]

    # Batch tile: multiple of 8 sublanes, large default to amortize per-step overhead,
    # and capped at ceil(B/2) so there are >= 2 grid steps whenever the batch allows
    # (lets the "parallel" axis shard across both v7x TensorCores).
    half = _round_up(max(1, -(-B // 2)), 8)
    tb = min(tile_b, half, _round_up(B, 8))
    Bp = _round_up(B, tb)
    if Bp != B:
        x = jnp.pad(x, ((0, Bp - B), (0, 0)))

    flops = 2 * Bp * (4 * H + L * H * H + H * W_PAD) + 4 * Bp * H * L
    bytes_accessed = (4 * Bp * 4                      # x read (f32)
                      + 4 * (4 * H + (L + 2) * W_PAD)  # f32 weights/biases
                      + 2 * (L * H * H + H * W_PAD)    # bf16 weights
                      + 4 * Bp * OUT_W)                # narrow f32 output write
    cost = pl.CostEstimate(flops=flops,
                           transcendentals=Bp * H * L,
                           bytes_accessed=bytes_accessed)

    out = pl.pallas_call(
        mlp_kernel,
        out_shape=jax.ShapeDtypeStruct((Bp, OUT_W), jnp.float32),
        grid=(Bp // tb,),
        in_specs=[
            pl.BlockSpec((tb, 4), lambda i: (i, 0)),             # x tile
            pl.BlockSpec((4, H), lambda i: (0, 0)),              # input projection (f32)
            pl.BlockSpec((L, H, H), lambda i: (0, 0, 0)),        # folded block weights (bf16)
            pl.BlockSpec((L + 2, W_PAD), lambda i: (0, 0)),      # packed bias slab (f32)
            pl.BlockSpec((H, W_PAD), lambda i: (0, 0)),          # padded logits weights (bf16)
        ],
        out_specs=pl.BlockSpec((tb, OUT_W), lambda i: (i, 0)),
        compiler_params=pltpu.CompilerParams(
            dimension_semantics=("parallel",)),
        cost_estimate=cost,
    )(x, prep["w_in"], prep["w_blk"], prep["bias"], prep["w_out"])

    return out[:B]


def init_params(key, hidden_layer=32, hidden_layers=2):
    """Raw (PyTorch-equivalent) parameters; Linear weights stored as (in, out)."""
    H, L = hidden_layer, hidden_layers
    ks = jax.random.split(key, 10)
    w_in = jax.random.normal(ks[0], (4, H), jnp.float32) * 0.1
    b_in = 0.05 * jax.random.normal(ks[1], (1, H), jnp.float32)
    w_blk = jax.random.normal(ks[2], (L, H, H), jnp.float32) * 0.1
    b_blk = 0.05 * jax.random.normal(ks[3], (L, 1, H), jnp.float32)
    # Non-trivial BN running stats so the constant-fold is actually validated.
    gamma = 1.0 + 0.1 * jax.random.normal(ks[4], (L, 1, H), jnp.float32)
    beta = 0.05 * jax.random.normal(ks[5], (L, 1, H), jnp.float32)
    mean = 0.1 * jax.random.normal(ks[6], (L, 1, H), jnp.float32)
    var = 1.0 + 0.2 * jax.random.uniform(ks[7], (L, 1, H), jnp.float32)
    w_out = jax.random.normal(ks[8], (H, 2), jnp.float32) * 0.1
    b_out = 0.05 * jax.random.normal(ks[9], (1, 2), jnp.float32)
    return dict(w_in=w_in, b_in=b_in, w_blk=w_blk, b_blk=b_blk,
                gamma=gamma, beta=beta, mean=mean, var=var,
                w_out=w_out, b_out=b_out)


def reference_forward(x, p, eps=1e-5):
    """Pure-JAX reference on the RAW (unfolded) parameters — matches PyTorch eval() math."""
    h = x @ p["w_in"] + p["b_in"]
    L = p["w_blk"].shape[0]
    for l in range(L):
        y = h @ p["w_blk"][l] + p["b_blk"][l]
        y = (y - p["mean"][l]) * jax.lax.rsqrt(p["var"][l] + eps) * p["gamma"][l] + p["beta"][l]
        y = y * jax.nn.sigmoid(y)
        h = h + y
    return h @ p["w_out"] + p["b_out"]


if __name__ == "__main__":
    key = jax.random.PRNGKey(0)
    k_x, k_x2, k_p = jax.random.split(key, 3)
    H, L = 32, 2
    raw_params = init_params(k_p, hidden_layer=H, hidden_layers=L)
    prep = prepare_params(raw_params)                      # one-time BN fold + packing

    # Tiny RL-style batch (single grid step).
    B = 8
    x = jax.random.normal(k_x, (B, 4), jnp.float32)        # CartPole observation dim = 4
    out = jax.block_until_ready(model_forward(x, prep))
    ref = reference_forward(x, raw_params)
    assert out.shape == (B, 2)
    assert jnp.allclose(out, ref, atol=2e-2, rtol=2e-2), float(jnp.max(jnp.abs(out - ref)))

    # Non-multiple batch -> exercises padding and the >=2-grid-step (two-TensorCore) path.
    B2 = 270
    x2 = jax.random.normal(k_x2, (B2, 4), jnp.float32)
    out2 = jax.block_until_ready(model_forward(x2, prep))
    ref2 = reference_forward(x2, raw_params)
    assert out2.shape == (B2, 2)
    assert jnp.allclose(out2, ref2, atol=2e-2, rtol=2e-2), float(jnp.max(jnp.abs(out2 - ref2)))

    print("KERNEL_OK")
</pallas_src>

<mosaic_0001>
module attributes {stable_mosaic.version = 11 : i64} {
  func.func @mlp_kernel(%arg0: i32, %arg1: memref<8x4xf32, #tpu.memory_space<vmem>>, %arg2: memref<4x32xf32, #tpu.memory_space<vmem>>, %arg3: memref<2x32x32xbf16, #tpu.memory_space<vmem>>, %arg4: memref<4x128xf32, #tpu.memory_space<vmem>>, %arg5: memref<32x128xbf16, #tpu.memory_space<vmem>>, %arg6: memref<8x2xf32, #tpu.memory_space<vmem>>) attributes {dimension_semantics = [#tpu.dimension_semantics<parallel>], iteration_bounds = array<i64: 1>, scalar_prefetch = 0 : i64, scratch_operands = 0 : i64, tpu.core_type = #tpu.core_type<tc>, window_params = [{transform_indices = @transform_0, window_bounds = array<i64: 8, 4>}, {pipeline_mode = #tpu.pipeline_mode<synchronous>, transform_indices = @transform_1, window_bounds = array<i64: 4, 32>}, {pipeline_mode = #tpu.pipeline_mode<synchronous>, transform_indices = @transform_2, window_bounds = array<i64: 2, 32, 32>}, {pipeline_mode = #tpu.pipeline_mode<synchronous>, transform_indices = @transform_3, window_bounds = array<i64: 4, 128>}, {pipeline_mode = #tpu.pipeline_mode<synchronous>, transform_indices = @transform_4, window_bounds = array<i64: 32, 128>}, {transform_indices = @transform_5, window_bounds = array<i64: 8, 2>}]} {
    %c0 = arith.constant 0 : index
    %c0_0 = arith.constant 0 : index
    %0 = vector.load %arg1[%c0, %c0_0] : memref<8x4xf32, #tpu.memory_space<vmem>>, vector<8x4xf32>
    %c0_1 = arith.constant 0 : index
    %c0_2 = arith.constant 0 : index
    %1 = vector.load %arg2[%c0_1, %c0_2] : memref<4x32xf32, #tpu.memory_space<vmem>>, vector<4x32xf32>
    %2 = vector.extract_strided_slice %0 {offsets = [0, 0], sizes = [8, 1], strides = [1, 1]} : vector<8x4xf32> to vector<8x1xf32>
    %3 = vector.extract_strided_slice %1 {offsets = [0, 0], sizes = [1, 32], strides = [1, 1]} : vector<4x32xf32> to vector<1x32xf32>
    %4 = vector.broadcast %2 : vector<8x1xf32> to vector<8x32xf32>
    %5 = vector.broadcast %3 : vector<1x32xf32> to vector<8x32xf32>
    %6 = arith.mulf %4, %5 : vector<8x32xf32>
    %7 = vector.extract_strided_slice %0 {offsets = [0, 1], sizes = [8, 1], strides = [1, 1]} : vector<8x4xf32> to vector<8x1xf32>
    %8 = vector.extract_strided_slice %1 {offsets = [1, 0], sizes = [1, 32], strides = [1, 1]} : vector<4x32xf32> to vector<1x32xf32>
    %9 = vector.broadcast %7 : vector<8x1xf32> to vector<8x32xf32>
    %10 = vector.broadcast %8 : vector<1x32xf32> to vector<8x32xf32>
    %11 = arith.mulf %9, %10 : vector<8x32xf32>
    %12 = arith.addf %6, %11 : vector<8x32xf32>
    %13 = vector.extract_strided_slice %0 {offsets = [0, 2], sizes = [8, 1], strides = [1, 1]} : vector<8x4xf32> to vector<8x1xf32>
    %14 = vector.extract_strided_slice %1 {offsets = [2, 0], sizes = [1, 32], strides = [1, 1]} : vector<4x32xf32> to vector<1x32xf32>
    %15 = vector.broadcast %13 : vector<8x1xf32> to vector<8x32xf32>
    %16 = vector.broadcast %14 : vector<1x32xf32> to vector<8x32xf32>
    %17 = arith.mulf %15, %16 : vector<8x32xf32>
    %18 = arith.addf %12, %17 : vector<8x32xf32>
    %19 = vector.extract_strided_slice %0 {offsets = [0, 3], sizes = [8, 1], strides = [1, 1]} : vector<8x4xf32> to vector<8x1xf32>
    %20 = vector.extract_strided_slice %1 {offsets = [3, 0], sizes = [1, 32], strides = [1, 1]} : vector<4x32xf32> to vector<1x32xf32>
    %21 = vector.broadcast %19 : vector<8x1xf32> to vector<8x32xf32>
    %22 = vector.broadcast %20 : vector<1x32xf32> to vector<8x32xf32>
    %23 = arith.mulf %21, %22 : vector<8x32xf32>
    %24 = arith.addf %18, %23 : vector<8x32xf32>
    %c0_3 = arith.constant 0 : index
    %c0_4 = arith.constant 0 : index
    %25 = vector.load %arg4[%c0_3, %c0_4] : memref<4x128xf32, #tpu.memory_space<vmem>>, vector<1x32xf32>
    %26 = vector.broadcast %25 : vector<1x32xf32> to vector<8x32xf32>
    %27 = arith.addf %24, %26 : vector<8x32xf32>
    %28 = arith.truncf %27 : vector<8x32xf32> to vector<8x32xbf16>
    %c0_5 = arith.constant 0 : index
    %c0_6 = arith.constant 0 : index
    %c0_7 = arith.constant 0 : index
    %29 = vector.load %arg3[%c0_5, %c0_6, %c0_7] : memref<2x32x32xbf16, #tpu.memory_space<vmem>>, vector<1x32x32xbf16>
    %30 = vector.shape_cast %29 : vector<1x32x32xbf16> to vector<32x32xbf16>
    %cst = arith.constant dense<0.000000e+00> : vector<8x32xf32>
    %31 = tpu.matmul %28, %30, %cst {dimension_numbers = #tpu.dot_dimension_numbers<[1], [0], [0], [1], [0, 0, 1, 1], [], []>} : vector<8x32xbf16>, vector<32x32xbf16>, vector<8x32xf32> -> vector<8x32xf32>
    %c1 = arith.constant 1 : index
    %c0_8 = arith.constant 0 : index
    %32 = vector.load %arg4[%c1, %c0_8] : memref<4x128xf32, #tpu.memory_space<vmem>>, vector<1x32xf32>
    %33 = vector.broadcast %32 : vector<1x32xf32> to vector<8x32xf32>
    %34 = arith.addf %31, %33 : vector<8x32xf32>
    %35 = arith.negf %34 : vector<8x32xf32>
    %36 = math.exp %35 : vector<8x32xf32>
    %cst_9 = arith.constant 1.000000e+00 : f32
    %37 = vector.broadcast %cst_9 : f32 to vector<8x32xf32>
    %38 = arith.addf %37, %36 : vector<8x32xf32>
    %39 = arith.divf %37, %38 : vector<8x32xf32>
    %40 = arith.mulf %34, %39 : vector<8x32xf32>
    %41 = arith.addf %27, %40 : vector<8x32xf32>
    %42 = arith.truncf %41 : vector<8x32xf32> to vector<8x32xbf16>
    %c1_10 = arith.constant 1 : index
    %c0_11 = arith.constant 0 : index
    %c0_12 = arith.constant 0 : index
    %43 = vector.load %arg3[%c1_10, %c0_11, %c0_12] : memref<2x32x32xbf16, #tpu.memory_space<vmem>>, vector<1x32x32xbf16>
    %44 = vector.shape_cast %43 : vector<1x32x32xbf16> to vector<32x32xbf16>
    %cst_13 = arith.constant dense<0.000000e+00> : vector<8x32xf32>
    %45 = tpu.matmul %42, %44, %cst_13 {dimension_numbers = #tpu.dot_dimension_numbers<[1], [0], [0], [1], [0, 0, 1, 1], [], []>} : vector<8x32xbf16>, vector<32x32xbf16>, vector<8x32xf32> -> vector<8x32xf32>
    %c2 = arith.constant 2 : index
    %c0_14 = arith.constant 0 : index
    %46 = vector.load %arg4[%c2, %c0_14] : memref<4x128xf32, #tpu.memory_space<vmem>>, vector<1x32xf32>
    %47 = vector.broadcast %46 : vector<1x32xf32> to vector<8x32xf32>
    %48 = arith.addf %45, %47 : vector<8x32xf32>
    %49 = arith.negf %48 : vector<8x32xf32>
    %50 = math.exp %49 : vector<8x32xf32>
    %cst_15 = arith.constant 1.000000e+00 : f32
    %51 = vector.broadcast %cst_15 : f32 to vector<8x32xf32>
    %52 = arith.addf %51, %50 : vector<8x32xf32>
    %53 = arith.divf %51, %52 : vector<8x32xf32>
    %54 = arith.mulf %48, %53 : vector<8x32xf32>
    %55 = arith.addf %41, %54 : vector<8x32xf32>
    %56 = arith.truncf %55 : vector<8x32xf32> to vector<8x32xbf16>
    %c0_16 = arith.constant 0 : index
    %c0_17 = arith.constant 0 : index
    %57 = vector.load %arg5[%c0_16, %c0_17] : memref<32x128xbf16, #tpu.memory_space<vmem>>, vector<32x128xbf16>
    %cst_18 = arith.constant dense<0.000000e+00> : vector<8x128xf32>
    %58 = tpu.matmul %56, %57, %cst_18 {dimension_numbers = #tpu.dot_dimension_numbers<[1], [0], [0], [1], [0, 0, 1, 1], [], []>} : vector<8x32xbf16>, vector<32x128xbf16>, vector<8x128xf32> -> vector<8x128xf32>
    %59 = vector.extract_strided_slice %58 {offsets = [0, 0], sizes = [8, 2], strides = [1, 1]} : vector<8x128xf32> to vector<8x2xf32>
    %c3 = arith.constant 3 : index
    %c0_19 = arith.constant 0 : index
    %60 = vector.load %arg4[%c3, %c0_19] : memref<4x128xf32, #tpu.memory_space<vmem>>, vector<1x2xf32>
    %61 = vector.broadcast %60 : vector<1x2xf32> to vector<8x2xf32>
    %62 = arith.addf %59, %61 : vector<8x2xf32>
    %c0_20 = arith.constant 0 : index
    %c0_21 = arith.constant 0 : index
    %63 = vector.load %arg6[%c0_20, %c0_21] : memref<8x2xf32, #tpu.memory_space<vmem>>, vector<8x2xf32>
    tpu.vector_store %arg6[%c0_20, %c0_21], %62 {strides = array<i32>} : memref<8x2xf32, #tpu.memory_space<vmem>>, vector<8x2xf32>,
    return
  }
  func.func @transform_0(%arg0: i32) -> (i32, i32) {
    %c0_i32 = arith.constant 0 : i32
    %c0_i32_0 = arith.constant 0 : i32
    return %arg0, %c0_i32 : i32, i32
  }
  func.func @transform_1(%arg0: i32) -> (i32, i32) {
    %c0_i32 = arith.constant 0 : i32
    %c0_i32_0 = arith.constant 0 : i32
    %c0_i32_1 = arith.constant 0 : i32
    return %c0_i32, %c0_i32_0 : i32, i32
  }
  func.func @transform_2(%arg0: i32) -> (i32, i32, i32) {
    %c0_i32 = arith.constant 0 : i32
    %c0_i32_0 = arith.constant 0 : i32
    %c0_i32_1 = arith.constant 0 : i32
    %c0_i32_2 = arith.constant 0 : i32
    return %c0_i32, %c0_i32_0, %c0_i32_1 : i32, i32, i32
  }
  func.func @transform_3(%arg0: i32) -> (i32, i32) {
    %c0_i32 = arith.constant 0 : i32
    %c0_i32_0 = arith.constant 0 : i32
    %c0_i32_1 = arith.constant 0 : i32
    return %c0_i32, %c0_i32_0 : i32, i32
  }
  func.func @transform_4(%arg0: i32) -> (i32, i32) {
    %c0_i32 = arith.constant 0 : i32
    %c0_i32_0 = arith.constant 0 : i32
    %c0_i32_1 = arith.constant 0 : i32
    return %c0_i32, %c0_i32_0 : i32, i32
  }
  func.func @transform_5(%arg0: i32) -> (i32, i32) {
    %c0_i32 = arith.constant 0 : i32
    %c0_i32_0 = arith.constant 0 : i32
    return %arg0, %c0_i32 : i32, i32
  }
}

</mosaic_0001>

<bundles_post_ra>
// kernel: tpu_custom_call.1
= control target key start
LH: loop header
LB: loop body
LE: loop exit
PB: predicated region body
PF: predicated region fallthrough
CT: control target
= control target key end

     0   :  { %10 = vsyncpa [#allocation3], 0  ;;  %s424_s0 = inlined_call_operand.vmem [shape: f32[8,4], index: 0, kind: input, shape index: {}]   ;;  %s425_s1 = inlined_call_operand.vmem [shape: f32[4,32], index: 1, kind: input, shape index: {}]   ;;  %s426_s2 = inlined_call_operand.hbm [shape: bf16[2,32,32], index: 2, kind: input, shape index: {}]   ;;  %s427_s3 = inlined_call_operand.vmem [shape: f32[4,128], index: 3, kind: input, shape index: {}]   ;;  %s428_s4 = inlined_call_operand.hbm [shape: bf16[32,128], index: 4, kind: input, shape index: {}]   ;;  %s429_s5 = inlined_call_operand.vmem [shape: f32[8,2], index: 5, kind: output, shape index: {}]  }
   0x1   :  { %s20_s20 = sshll.u32 %s426_s2, 4  ;;  %s21_s20 = int_to_ptr.hbm [resolvable:$true] %s20_s20 }
   0x2   :  { %11 = vsyncpa [#allocation5], 0  ;;  %s356_s21 = smov [#allocation2]   ;;  %s35_s25 = sshll.u32 %s428_s4, 4  ;;  %s36_s25 = int_to_ptr.hbm [resolvable:$true] %s35_s25 }
   0x3   :  { %s22_s22 = sshll.u32 %s356_s21, 4  ;;  %s357_s26 = smov 64   ;;  %s23_s22 = int_to_ptr.vmem [resolvable:$true] %s22_s22 }
   0x4   :  { %s358_s27 = smov 4   ;;  %s359_s28 = smov [#allocation4]  }
   0x5   :  { %28 = dma.hbm_to_vmem [thread:$0]  %s21_s20, 512, %s23_s22, [#allocation3], %s357_s26, %s357_s26, %s358_s27  }
   0x6   :  { %s37_s29 = sshll.u32 %s359_s28, 4  ;;  %s38_s29 = int_to_ptr.vmem [resolvable:$true] %s37_s29 }
   0x7   :  { %43 = dma.hbm_to_vmem [thread:$0]  %s36_s25, 256, %s38_s29, [#allocation5], %s357_s26, %s357_s26, %s358_s27  }
   0x8   :  { %352 = dma.done.wait [#allocation3], 512  }
   0x9   :  { %353 = vsyncadd [#allocation3], 4294966784 }
   0xa   :  { %354 = dma.done.wait [#allocation5], 256  }
   0xb   :  { %355 = vsyncadd [#allocation5], 4294967040  ;;  %v360_v0 = vmov 0   ;;  %v361_v1 = vmov 2   ;;  %v53_v2 = vld [vmem:[%s424_s0] sm:$0xff]  ;;  %v362_v3 = vmov 1  }
   0xc   :  { %287 = vset.pattern.permute.xlu0 %v360_v0  ;;  %289 = vset.pattern.permute.xlu1 %v361_v1  ;;  %v363_v4 = vmov 3   ;;  %v274_v5 = vld [vmem:[#allocation2 + $0x8] sm:$0xff]  ;;  %v273_v6 = vld [vmem:[#allocation2] sm:$0xff]  ;;  %vm105_vm0 = vcmask 261120   ;;  %v276_v26 = vld [vmem:[#allocation2 + $0x18] sm:$0xff]  ;;  %vm236_vm9 = vcmask 15360  }
   0xd   :  { %57 = vperm.xlu0 %287, %v53_v2   ;;  %70 = vperm.xlu1 %289, %v53_v2   ;;  %v54_v9 = vld [vmem:[%s425_s1] sm:$0xf]  ;;  %v275_v29 = vld [vmem:[#allocation2 + $0x10] sm:$0xff]  ;;  %v278_v48 = vld [vmem:[#allocation4 + $0x8] sm:$0xff] }
   0xe   :  { %115 = vmatpush.bf16.msra.mxu0 %v274_v5  ;;  %v60_v10 = vperm.slane %v54_v9, 0  ;;  %v66_v11 = vperm.slane %v54_v9, 1  ;;  %v73_v12 = vperm.slane %v54_v9, 2  ;;  %v80_v13 = vperm.slane %v54_v9, 3  ;;  %v292_v21 = vld [vmem:[%s427_s3] ss:$0 sm:$0xff]  ;;  %172 = vmatpush.bf16.msra.mxu1 %v276_v26 }
   0xf   :  { %v293_v27 = vld [vmem:[%s427_s3 + $0x1] ss:$0 sm:$0xff]  ;;  %v294_v49 = vld [vmem:[%s427_s3 + $0x2] ss:$0 sm:$0xff]  ;;  %226 = vmatpush.bf16.msra.mxu2 %v278_v48 }
  0x10   :  { %v277_v50 = vld [vmem:[#allocation4] sm:$0xff] }
  0x12   :  { %116 = vmatpush.bf16.msra.mxu0 %v273_v6  ;;  %173 = vmatpush.bf16.msra.mxu1 %v275_v29  ;;  %v295_v6 = vld [vmem:[%s427_s3 + $0x3] ss:$0 sm:$0xff] }
  0x13   :  { %227 = vmatpush.bf16.msra.mxu2 %v277_v50 }
  0x15   :  { %288 = vset.pattern.permute.xlu0 %v362_v3  ;;  %290 = vset.pattern.permute.xlu1 %v363_v4 }
  0x16   :  { %63 = vperm.xlu0 %288, %v53_v2   ;;  %77 = vperm.xlu1 %290, %v53_v2  }
  0x1e   :  { %291 = vset.pattern.permute.xlu0 %v363_v4 }
  0x7f   :  { %v58_v7 = vpop.permute.xlu0 %57  ;;  %v71_v8 = vpop.permute.xlu1 %70 }
  0x80   :  { %v61_v16 = vmul.f32 %v60_v10, %v58_v7  ;;  %v74_v18 = vmul.f32 %v73_v12, %v71_v8 }
  0x88   :  { %v64_v14 = vpop.permute.xlu0 %63  ;;  %v78_v15 = vpop.permute.xlu1 %77 }
  0x89   :  { %v67_v17 = vmul.f32 %v66_v11, %v64_v14  ;;  %v81_v20 = vmul.f32 %v80_v13, %v78_v15 }
  0x8b   :  { %v68_v19 = vadd.f32 %v67_v17, %v61_v16 }
  0x8d   :  { %v75_v22 = vadd.f32 %v74_v18, %v68_v19 }
  0x8f   :  { %v82_v23 = vadd.f32 %v81_v20, %v75_v22 }
  0x91   :  { %v85_v24 = vadd.f32 %v292_v21, %v82_v23 }
  0x93   :  { %v86_v25 = vpack.c.bf16 %v85_v24, %v85_v24 }
  0x95   :  { %252 = vmatmul.msk.bf16.vlgmr.msra.gmra.mxu0 %vm105_vm0, %v86_v25 }
 0x112   :  { %v118_v28 = vpop.f32.mrf.mxu0 }
 0x113   :  { %v119_v30 = vadd.f32 %v293_v27, %v118_v28 }
 0x115   :  { %v253_v31 = vmul.f32 -1.442695, %v119_v30 }
 0x117   :  { %296 = vpow2.f32 %v253_v31 }
 0x11a   :  { %v120_v32 = vpop.f32.mrf.mxu0 }
 0x11d   :  { %v297_v33 = vpop.eup %296 }
 0x11e   :  { %v125_v34 = vadd.f32 1.0, %v297_v33 }
 0x120   :  { %298 = vrcp.f32 %v125_v34  ;;  %v137_v38 = vand.u32 2147483648, %v125_v34  ;;  %v135_v40 = vand.u32 2147483647, %v125_v34  ;;  %vm131_vm2 = vweird.f32 %v125_v34 }
 0x122   :  { %v138_v42 = vor.u32 1.1754944e-38, %v137_v38  ;;  %vm136_vm4 = vcmp.eq.f32.partialorder %v135_v40, 8.507059e+37 }
 0x126   :  { %v299_v35 = vpop.eup %298 }
 0x127   :  { %v127_v36 = vmul.f32 %v299_v35, %v125_v34  ;;  %vm132_vm1 = vweird.f32 %v299_v35 }
 0x128   :  { %vm133_vm3 = vmor %vm131_vm2, %vm132_vm1 }
 0x129   :  { %v128_v37 = vsub.f32 1.0, %v127_v36 }
 0x12b   :  { %v129_v39 = vmul.f32 %v299_v35, %v128_v37 }
 0x12d   :  { %v130_v41 = vadd.f32 %v299_v35, %v129_v39 }
 0x12f   :  { %v134_v43 = vsel %vm133_vm3, %v299_v35, %v130_v41 }
 0x130   :  { %v139_v44 = vsel %vm136_vm4, %v138_v42, %v134_v43 }
 0x131   :  { %v141_v45 = vmul.f32 %v139_v44, %v119_v30 }
 0x133   :  { %v142_v46 = vadd.f32 %v141_v45, %v85_v24 }
 0x135   :  { %v143_v47 = vpack.c.bf16 %v142_v46, %v142_v46 }
 0x137   :  { %262 = vmatmul.msk.bf16.vlgmr.msra.gmra.mxu1 %vm105_vm0, %v143_v47 }
 0x1b4   :  { %v175_v51 = vpop.f32.mrf.mxu1 }
 0x1b5   :  { %v176_v52 = vadd.f32 %v294_v49, %v175_v51 }
 0x1b7   :  { %v263_v53 = vmul.f32 -1.442695, %v176_v52 }
 0x1b9   :  { %300 = vpow2.f32 %v263_v53 }
 0x1bc   :  { %v177_v54 = vpop.f32.mrf.mxu1 }
 0x1bf   :  { %v301_v55 = vpop.eup %300 }
 0x1c0   :  { %v182_v56 = vadd.f32 1.0, %v301_v55 }
 0x1c2   :  { %302 = vrcp.f32 %v182_v56  ;;  %v194_v60 = vand.u32 2147483648, %v182_v56  ;;  %v192_v62 = vand.u32 2147483647, %v182_v56  ;;  %vm188_vm6 = vweird.f32 %v182_v56 }
 0x1c4   :  { %v195_v0 = vor.u32 1.1754944e-38, %v194_v60  ;;  %vm193_vm8 = vcmp.eq.f32.partialorder %v192_v62, 8.507059e+37 }
 0x1c8   :  { %v303_v57 = vpop.eup %302 }
 0x1c9   :  { %v184_v58 = vmul.f32 %v303_v57, %v182_v56  ;;  %vm189_vm5 = vweird.f32 %v303_v57 }
 0x1ca   :  { %vm190_vm7 = vmor %vm188_vm6, %vm189_vm5 }
 0x1cb   :  { %v185_v59 = vsub.f32 1.0, %v184_v58 }
 0x1cd   :  { %v186_v61 = vmul.f32 %v303_v57, %v185_v59 }
 0x1cf   :  { %v187_v63 = vadd.f32 %v303_v57, %v186_v61 }
 0x1d1   :  { %v191_v1 = vsel %vm190_vm7, %v303_v57, %v187_v63 }
 0x1d2   :  { %v196_v2 = vsel %vm193_vm8, %v195_v0, %v191_v1 }
 0x1d3   :  { %v198_v3 = vmul.f32 %v196_v2, %v176_v52 }
 0x1d5   :  { %v199_v4 = vadd.f32 %v198_v3, %v142_v46 }
 0x1d7   :  { %v200_v5 = vpack.c.bf16 %v199_v4, %v199_v4 }
 0x1d9   :  { %272 = vmatmul.msk.bf16.vlgmr.msra.gmra.mxu2 %vm105_vm0, %v200_v5 }
 0x25c   :  { %v229_v7 = vpop.f32.mrf.mxu2 }
 0x25d   :  { %v235_v8 = vadd.f32 %v295_v6, %v229_v7 }
 0x25f   :  { %237 = vst.msk [vmem:[%s429_s5] sm:$0xff] %vm236_vm9, %v235_v8 }
 0x264   :  { %v231_v9 = vpop.f32.mrf.mxu2 }
 0x265   :  { %242 = vsyncpa [#allocation3], 1 }
 0x266   :  { %243 = vsyncpa [#allocation5], 1 }

</bundles_post_ra>
